<compile_context>
chip_gen: v7x
topology: tpu7x:2x2x1
jax: 0.10.0
libtpu: 0.0.40
codegen_flags: <defaults>
</compile_context>

<pallas_src>
import functools

import jax
import jax.numpy as jnp
from jax.experimental import pallas as pl
from jax.experimental.pallas import tpu as pltpu


def _round_up(x, m):
    return (x + m - 1) // m * m


def _loss_kernel(pred_ref, gt_ref, conf_ref, sum_ref, cnt_ref, *, a, b):
    i = pl.program_id(1)

    @pl.when(i == 0)
    def _():
        sum_ref[...] = jnp.zeros_like(sum_ref)
        cnt_ref[...] = jnp.zeros_like(cnt_ref)

    gt = gt_ref[...].astype(jnp.float32)          # (B, C, TN)
    pred = pred_ref[...].astype(jnp.float32)      # (B, C, TN)
    conf = conf_ref[...].astype(jnp.float32)      # (B, TN)

    # mask from channel 0 of gt only (matches mask[:, 0, :, :]); padded pixels
    # were filled with NaN so they drop out here.
    mask = jnp.isfinite(gt[:, 0, :])                            # (B, TN) bool

    l1 = jnp.sum(jnp.abs(gt - pred), axis=1)                    # (B, TN)
    # 2a*(sigmoid(x/b) - 0.5) == a*tanh(x/(2b)); use exp(-c) instead of /exp(c).
    c = a * jnp.tanh(conf * (0.5 / b))                          # (B, TN)
    val = l1 * jnp.exp(-c) + c                                  # (B, TN)
    val = jnp.where(mask, val, 0.0)

    # Elementwise VPU accumulation into the resident output blocks.
    sum_ref[...] += val[None]                                   # (1, B, TN)
    cnt_ref[...] += mask.astype(jnp.float32)[None]


def _pick_tile(B, C, in_itemsize, n, *, vmem_budget=16 * 1024 * 1024,
               max_tn=32 * 1024):
    """Largest 128-multiple lane tile whose double-buffered VMEM blocks fit."""
    bp = _round_up(B, 8)      # sublane padding of (B, TN) blocks
    cp = _round_up(C, 8)      # sublane padding of (B, C, TN) blocks
    per_lane = (2 * B * cp * in_itemsize   # pred + gt blocks
                + bp * in_itemsize         # conf block
                + 2 * bp * 4)              # two f32 accumulator blocks
    tn = vmem_budget // (2 * per_lane)     # ~x2 pipeline buffers
    tn = max(128, min(max_tn, (tn // 128) * 128))
    return min(tn, _round_up(n, 128))


def laplacian_loss_bounded2(predictions, gt, conf, a=3.0, b=3.0, *, nsplit=2):
    """predictions, gt: (B, C, H, W); conf: (B, 1, H, W). Returns scalar f32."""
    B, C, H, W = gt.shape
    N = H * W

    pred_f = predictions.reshape(B, C, N)
    gt_f = gt.reshape(B, C, N)
    conf_f = conf.reshape(B, N)

    TN = _pick_tile(B, C, jnp.dtype(gt_f.dtype).itemsize, N)
    chunk = nsplit * TN
    n_pad = _round_up(N, chunk)
    pad = n_pad - N
    if pad:
        pred_f = jnp.pad(pred_f, ((0, 0), (0, 0), (0, pad)))
        # NaN padding on gt channel(s): the finite mask excludes padded pixels.
        gt_f = jnp.pad(gt_f, ((0, 0), (0, 0), (0, pad)),
                       constant_values=float("nan"))
        conf_f = jnp.pad(conf_f, ((0, 0), (0, pad)))

    n_inner = n_pad // chunk
    grid = (nsplit, n_inner)

    kernel = functools.partial(_loss_kernel, a=float(a), b=float(b))

    sum_out, cnt_out = pl.pallas_call(
        kernel,
        out_shape=(
            jax.ShapeDtypeStruct((nsplit, B, TN), jnp.float32),
            jax.ShapeDtypeStruct((nsplit, B, TN), jnp.float32),
        ),
        grid_spec=pltpu.PrefetchScalarGridSpec(
            num_scalar_prefetch=0,
            grid=grid,
            in_specs=[
                pl.BlockSpec((B, C, TN), lambda s, i: (0, 0, s * n_inner + i)),
                pl.BlockSpec((B, C, TN), lambda s, i: (0, 0, s * n_inner + i)),
                pl.BlockSpec((B, TN), lambda s, i: (0, s * n_inner + i)),
            ],
            out_specs=(
                pl.BlockSpec((1, B, TN), lambda s, i: (s, 0, 0)),
                pl.BlockSpec((1, B, TN), lambda s, i: (s, 0, 0)),
            ),
        ),
        compiler_params=pltpu.CompilerParams(
            dimension_semantics=("parallel", "arbitrary"),
            vmem_limit_bytes=32 * 1024 * 1024,
        ),
    )(pred_f, gt_f, conf_f)

    # masked mean = masked sum / masked count (0/0 -> NaN, like torch .mean()
    # over an empty selection).
    return jnp.sum(sum_out) / jnp.sum(cnt_out)


def _reference(predictions, gt, conf, a=3.0, b=3.0):
    mask = jnp.isfinite(gt)[:, 0, :, :]
    c = conf[:, 0, :, :]
    c = 2.0 * a * (jax.nn.sigmoid(c / b) - 0.5)
    val = jnp.sum(jnp.abs(gt - predictions), axis=1) / jnp.exp(c) + c
    val = jnp.where(mask, val, 0.0)
    return jnp.sum(val) / jnp.sum(mask.astype(jnp.float32))


if __name__ == "__main__":
    key = jax.random.PRNGKey(0)

    # Case 1: standard small shape, with one non-finite gt pixel (mask path).
    k1, k2, k3, k4, k5, k6 = jax.random.split(key, 6)
    B, C, H, W = 2, 4, 16, 16
    predictions = jax.random.normal(k1, (B, C, H, W), dtype=jnp.float32)
    gt = jax.random.normal(k2, (B, C, H, W), dtype=jnp.float32)
    conf = jax.random.normal(k3, (B, 1, H, W), dtype=jnp.float32)
    gt = gt.at[0, 0, 0, 0].set(jnp.inf)

    loss = laplacian_loss_bounded2(predictions, gt, conf, a=3.0, b=3.0)
    loss = jax.block_until_ready(loss)
    ref = _reference(predictions, gt, conf, a=3.0, b=3.0)
    assert jnp.allclose(loss, ref, rtol=1e-5, atol=1e-5), (loss, ref)

    # Case 2: spatial size not a multiple of 128 (exercises the NaN-padding path).
    H2, W2 = 20, 20
    predictions2 = jax.random.normal(k4, (B, C, H2, W2), dtype=jnp.float32)
    gt2 = jax.random.normal(k5, (B, C, H2, W2), dtype=jnp.float32)
    conf2 = jax.random.normal(k6, (B, 1, H2, W2), dtype=jnp.float32)
    gt2 = gt2.at[1, 0, 3, 7].set(jnp.nan)

    loss2 = laplacian_loss_bounded2(predictions2, gt2, conf2, a=3.0, b=3.0)
    loss2 = jax.block_until_ready(loss2)
    ref2 = _reference(predictions2, gt2, conf2, a=3.0, b=3.0)
    assert jnp.allclose(loss2, ref2, rtol=1e-5, atol=1e-5), (loss2, ref2)

    print("KERNEL_OK")
</pallas_src>

<mosaic_0001>
module attributes {stable_mosaic.version = 11 : i64} {
  func.func @_loss_kernel(%arg0: i32, %arg1: i32, %arg2: memref<2x4x256xf32, #tpu.memory_space<vmem>>, %arg3: memref<2x4x256xf32, #tpu.memory_space<vmem>>, %arg4: memref<2x256xf32, #tpu.memory_space<vmem>>, %arg5: memref<1x2x256xf32, #tpu.memory_space<vmem>>, %arg6: memref<1x2x256xf32, #tpu.memory_space<vmem>>) attributes {dimension_semantics = [#tpu.dimension_semantics<parallel>, #tpu.dimension_semantics<arbitrary>], iteration_bounds = array<i64: 2, 1>, scalar_prefetch = 0 : i64, scratch_operands = 0 : i64, tpu.core_type = #tpu.core_type<tc>, window_params = [{transform_indices = @transform_0, window_bounds = array<i64: 2, 4, 256>}, {transform_indices = @transform_1, window_bounds = array<i64: 2, 4, 256>}, {transform_indices = @transform_2, window_bounds = array<i64: 2, 256>}, {transform_indices = @transform_3, window_bounds = array<i64: 1, 2, 256>}, {transform_indices = @transform_4, window_bounds = array<i64: 1, 2, 256>}]} {
    %c0_i32 = arith.constant 0 : i32
    %0 = arith.cmpi eq, %arg1, %c0_i32 : i32
    %1 = arith.extui %0 : i1 to i32
    %c0_i32_0 = arith.constant 0 : i32
    %2 = arith.cmpi ne, %1, %c0_i32_0 : i32
    scf.if %2 {
      %cst_25 = arith.constant 0.000000e+00 : f32
      %35 = vector.broadcast %cst_25 : f32 to vector<1x2x256xf32>
      %c0_26 = arith.constant 0 : index
      %c0_27 = arith.constant 0 : index
      %c0_28 = arith.constant 0 : index
      %36 = vector.load %arg5[%c0_26, %c0_27, %c0_28] : memref<1x2x256xf32, #tpu.memory_space<vmem>>, vector<1x2x256xf32>
      tpu.vector_store %arg5[%c0_26, %c0_27, %c0_28], %35 {strides = array<i32>} : memref<1x2x256xf32, #tpu.memory_space<vmem>>, vector<1x2x256xf32>,
      %cst_29 = arith.constant 0.000000e+00 : f32
      %37 = vector.broadcast %cst_29 : f32 to vector<1x2x256xf32>
      %c0_30 = arith.constant 0 : index
      %c0_31 = arith.constant 0 : index
      %c0_32 = arith.constant 0 : index
      %38 = vector.load %arg6[%c0_30, %c0_31, %c0_32] : memref<1x2x256xf32, #tpu.memory_space<vmem>>, vector<1x2x256xf32>
      tpu.vector_store %arg6[%c0_30, %c0_31, %c0_32], %37 {strides = array<i32>} : memref<1x2x256xf32, #tpu.memory_space<vmem>>, vector<1x2x256xf32>,
    } else {
    }
    %c0 = arith.constant 0 : index
    %c0_1 = arith.constant 0 : index
    %c0_2 = arith.constant 0 : index
    %3 = vector.load %arg3[%c0, %c0_1, %c0_2] : memref<2x4x256xf32, #tpu.memory_space<vmem>>, vector<2x4x256xf32>
    %c0_3 = arith.constant 0 : index
    %c0_4 = arith.constant 0 : index
    %c0_5 = arith.constant 0 : index
    %4 = vector.load %arg2[%c0_3, %c0_4, %c0_5] : memref<2x4x256xf32, #tpu.memory_space<vmem>>, vector<2x4x256xf32>
    %c0_6 = arith.constant 0 : index
    %c0_7 = arith.constant 0 : index
    %5 = vector.load %arg4[%c0_6, %c0_7] : memref<2x256xf32, #tpu.memory_space<vmem>>, vector<2x256xf32>
    %6 = vector.extract_strided_slice %3 {offsets = [0, 0, 0], sizes = [2, 1, 256], strides = [1, 1, 1]} : vector<2x4x256xf32> to vector<2x1x256xf32>
    %7 = vector.shape_cast %6 : vector<2x1x256xf32> to vector<2x256xf32>
    %8 = tpu.weird %7 : vector<2x256xf32> -> vector<2x256xi1>
    %cst = arith.constant dense<true> : vector<2x256xi1>
    %9 = arith.xori %8, %cst : vector<2x256xi1>
    %10 = arith.subf %3, %4 : vector<2x4x256xf32>
    %11 = math.absf %10 : vector<2x4x256xf32>
    %cst_8 = arith.constant dense<0.000000e+00> : vector<2x256xf32>
    %12 = vector.multi_reduction <add>, %11, %cst_8 [1] : vector<2x4x256xf32> to vector<2x256xf32>
    %cst_9 = arith.constant 0.166666672 : f32
    %13 = vector.broadcast %cst_9 : f32 to vector<2x256xf32>
    %14 = arith.mulf %5, %13 : vector<2x256xf32>
    %15 = math.tanh %14 : vector<2x256xf32>
    %cst_10 = arith.constant 3.000000e+00 : f32
    %16 = vector.broadcast %cst_10 : f32 to vector<2x256xf32>
    %17 = arith.mulf %16, %15 : vector<2x256xf32>
    %cst_11 = arith.constant 0.000000e+00 : f32
    %18 = vector.broadcast %cst_11 : f32 to vector<2x256xf32>
    %19 = arith.subf %18, %17 : vector<2x256xf32>
    %20 = math.exp %19 : vector<2x256xf32>
    %21 = arith.mulf %12, %20 : vector<2x256xf32>
    %22 = arith.addf %21, %17 : vector<2x256xf32>
    %cst_12 = arith.constant 0.000000e+00 : f32
    %23 = vector.broadcast %cst_12 : f32 to vector<2x256xf32>
    %24 = arith.select %9, %22, %23 : vector<2x256xi1>, vector<2x256xf32>
    %c0_13 = arith.constant 0 : index
    %c0_14 = arith.constant 0 : index
    %c0_15 = arith.constant 0 : index
    %25 = vector.load %arg5[%c0_13, %c0_14, %c0_15] : memref<1x2x256xf32, #tpu.memory_space<vmem>>, vector<1x2x256xf32>
    %26 = vector.shape_cast %24 : vector<2x256xf32> to vector<1x2x256xf32>
    %27 = arith.addf %25, %26 : vector<1x2x256xf32>
    %c0_16 = arith.constant 0 : index
    %c0_17 = arith.constant 0 : index
    %c0_18 = arith.constant 0 : index
    %28 = vector.load %arg5[%c0_16, %c0_17, %c0_18] : memref<1x2x256xf32, #tpu.memory_space<vmem>>, vector<1x2x256xf32>
    tpu.vector_store %arg5[%c0_16, %c0_17, %c0_18], %27 {strides = array<i32>} : memref<1x2x256xf32, #tpu.memory_space<vmem>>, vector<1x2x256xf32>,
    %c0_19 = arith.constant 0 : index
    %c0_20 = arith.constant 0 : index
    %c0_21 = arith.constant 0 : index
    %29 = vector.load %arg6[%c0_19, %c0_20, %c0_21] : memref<1x2x256xf32, #tpu.memory_space<vmem>>, vector<1x2x256xf32>
    %30 = arith.extui %9 : vector<2x256xi1> to vector<2x256xi32>
    %31 = arith.sitofp %30 : vector<2x256xi32> to vector<2x256xf32>
    %32 = vector.shape_cast %31 : vector<2x256xf32> to vector<1x2x256xf32>
    %33 = arith.addf %29, %32 : vector<1x2x256xf32>
    %c0_22 = arith.constant 0 : index
    %c0_23 = arith.constant 0 : index
    %c0_24 = arith.constant 0 : index
    %34 = vector.load %arg6[%c0_22, %c0_23, %c0_24] : memref<1x2x256xf32, #tpu.memory_space<vmem>>, vector<1x2x256xf32>
    tpu.vector_store %arg6[%c0_22, %c0_23, %c0_24], %33 {strides = array<i32>} : memref<1x2x256xf32, #tpu.memory_space<vmem>>, vector<1x2x256xf32>,
    return
  }
  func.func @transform_0(%arg0: i32, %arg1: i32) -> (i32, i32, i32) {
    %c1_i32 = arith.constant 1 : i32
    %0 = arith.muli %arg0, %c1_i32 : i32
    %1 = arith.addi %0, %arg1 : i32
    %c0_i32 = arith.constant 0 : i32
    %c0_i32_0 = arith.constant 0 : i32
    %c0_i32_1 = arith.constant 0 : i32
    return %c0_i32, %c0_i32_0, %1 : i32, i32, i32
  }
  func.func @transform_1(%arg0: i32, %arg1: i32) -> (i32, i32, i32) {
    %c1_i32 = arith.constant 1 : i32
    %0 = arith.muli %arg0, %c1_i32 : i32
    %1 = arith.addi %0, %arg1 : i32
    %c0_i32 = arith.constant 0 : i32
    %c0_i32_0 = arith.constant 0 : i32
    %c0_i32_1 = arith.constant 0 : i32
    return %c0_i32, %c0_i32_0, %1 : i32, i32, i32
  }
  func.func @transform_2(%arg0: i32, %arg1: i32) -> (i32, i32) {
    %c1_i32 = arith.constant 1 : i32
    %0 = arith.muli %arg0, %c1_i32 : i32
    %1 = arith.addi %0, %arg1 : i32
    %c0_i32 = arith.constant 0 : i32
    %c0_i32_0 = arith.constant 0 : i32
    return %c0_i32, %1 : i32, i32
  }
  func.func @transform_3(%arg0: i32, %arg1: i32) -> (i32, i32, i32) {
    %c0_i32 = arith.constant 0 : i32
    %c0_i32_0 = arith.constant 0 : i32
    %c0_i32_1 = arith.constant 0 : i32
    return %arg0, %c0_i32, %c0_i32_0 : i32, i32, i32
  }
  func.func @transform_4(%arg0: i32, %arg1: i32) -> (i32, i32, i32) {
    %c0_i32 = arith.constant 0 : i32
    %c0_i32_0 = arith.constant 0 : i32
    %c0_i32_1 = arith.constant 0 : i32
    return %arg0, %c0_i32, %c0_i32_0 : i32, i32, i32
  }
}

</mosaic_0001>

<bundles_post_ra>
// kernel: tpu_custom_call.1
= control target key start
LH: loop header
LB: loop body
LE: loop exit
PB: predicated region body
PF: predicated region fallthrough
CT: control target
= control target key end

     0   :  { %s1402_s0 = inlined_call_operand.hbm [shape: f32[2,4,512], index: 0, kind: input, shape index: {}]   ;;  %s1403_s1 = inlined_call_operand.hbm [shape: f32[2,4,512], index: 1, kind: input, shape index: {}]   ;;  %s1404_s2 = inlined_call_operand.hbm [shape: f32[2,512], index: 2, kind: input, shape index: {}]   ;;  %s1405_s3 = inlined_call_operand.hbm [shape: f32[2,2,256], index: 3, kind: output, shape index: {0}]   ;;  %s1406_s4 = inlined_call_operand.hbm [shape: f32[2,2,256], index: 4, kind: output, shape index: {1}]  }
   0x1   :  { %1416 = sst [smem:[#allocation18_spill]] %s1402_s0 }
   0x2   :  { %1417 = sst [smem:[#allocation19_spill]] %s1403_s1 }
   0x3   :  { %10 = vsyncpa [#allocation3], 0 }
   0x4   :  { %12 = vsyncpa [#allocation3 + $0x1], 0 }
   0x5   :  { %13 = vsyncpa [#allocation6], 0 }
   0x6   :  { %15 = vsyncpa [#allocation6 + $0x1], 0 }
   0x7   :  { %16 = vsyncpa [#allocation4], 0 }
   0x8   :  { %18 = vsyncpa [#allocation4 + $0x1], 0 }
   0x9   :  { %19 = vsyncpa [#allocation10], 0 }
   0xa   :  { %21 = vsyncpa [#allocation10 + $0x1], 0  ;;  %s1058_s15 = smov 0   ;;  %s1060_s16 = smov 0  }
   0xb   :  { %s1062_s17 = smov 0   ;;  %s1064_s18 = smov 0  }
   0xc   :  { %s1066_s19 = smov 0   ;;  %s1068_s20 = smov 0  }
   0xd LB: > { %1418 = sst [smem:[#allocation15_spill]] %s1008_s17  ;;  %s1089_s21 = sadd.s32 4294967295, %s1020_s20   ;;  %s1020_s20 = sphi %s1068_s20, %s27_s20   ;;  %s1016_s19 = sphi %s1066_s19, %s1451_s19   ;;  %s1012_s18 = sphi %s1064_s18, %s1450_s18   ;;  %s1008_s17 = sphi %s1062_s17, %s1446_s17   ;;  %s1004_s16 = sphi %s1060_s16, %s1449_s16   ;;  %s1000_s15 = sphi %s1058_s15, %s1448_s15  }
   0xe   : > { %s692_s22 = sadd.s32 4294967294, %s1020_s20   ;;  %s39_s23 = sadd.s32 1, %s1016_s19 }
   0xf   : > { %s48_s24 = sadd.s32 1, %s1008_s17  ;;  %p41_p0 = scmp.ge.s32.totalorder %s39_s23, 2 }
  0x10   : > { %p55_p1 = scmp.ne.s32.totalorder %s1008_s17, %s1004_s16  ;;  %p56_p2 = scmp.eq.s32.totalorder %s1020_s20, 0 }
  0x11   : > { %p61_p3 = scmp.ne.s32.totalorder %s1004_s16, %s1000_s15  ;;  %s1453_s23 = smov (%p41_p0, %s39_s23), 0 }
  0x12   : > { %1419 = sst [smem:[#allocation16_spill]] %s1453_s23  ;;  %p1101_p4 = por %p56_p2, %p55_p1 }
  0x13   : > { %p62_p5 = scmp.eq.s32.totalorder %s1089_s21, 0  ;;  %s45_s26 = ssub.s32 %s1016_s19, %s1453_s23 }
  0x14   : > { %p141_p6 = scmp.eq.s32.totalorder %s1089_s21, 1  ;;  %p46_p7 = scmp.eq.s32.totalorder %s45_s26, 0 }
  0x15   : > { %p1109_p8 = por %p62_p5, %p61_p3  ;;  %p147_p10 = scmp.eq.s32.totalorder %s692_s22, 1 }
  0x16   : > { %p1113_p9 = por %p141_p6, %p55_p1  ;;  %p752_p13 = scmp.lt.s32.totalorder %s1020_s20, 2 }
  0x17   : > { %s1421_s27 = scalar_select %p1109_p8, 1, 0 }
  0x18   : > { %s1422_s28 = scalar_select %p1113_p9, 1, 0 }
  0x19   : > { %s1118_s29 = scalar_select %p46_p7, %s1008_s17, %s48_s24  }
  0x1a   : > { %p1120_p11 = por %p147_p10, %p61_p3  ;;  %s1127_s5 = sand.u32 1, %s1008_s17  }
  0x1b   : > { %1423 = sst [smem:[#allocation17_spill]] %s1118_s29  ;;  %s1407_s6 = sshll.u32 %s1127_s5, 4 }
  0x1c   : > { %s1424_s30 = scalar_select %p1120_p11, 1, 0 }
  0x1d   : > { %s720_s7 = sshll.u32 %s1016_s19, 7  ;;  %p1133_p0 = pnand %p752_p13, %p1101_p4 }
  0x1e   : > { %s215_s9 = sand.u32 1, %s1020_s20   ;;  %s1426_s1 = sld [smem:[#allocation19_spill]] }
  0x1f   : > { %s1425_s8 = scalar_select %p1133_p0, 1, 0 }
  0x20   : > { %s219_s13 = scalar_lea.vmem [#allocation5], %s1407_s6  ;;  %s1150_s22 = scalar_lea.sflag [#allocation6], %s215_s9 }
  0x21   : > { %s227_s14 = sshll.u32 %s219_s13, 4  ;;  %p1156_p3 = pneg %p1133_p0  ;;  %s1147_s14 = int_to_ptr.vmem [resolvable:$true] %s227_s14 }
  0x24   : > { %s1143_s12 = scalar_lea.hbm %s1426_s1, %s720_s7  ;;  %s817_s11 = scalar_lea.hbm %s1426_s1, 512 }
  0x25   : > { %s812_s24 = scalar_lea.hbm %s1143_s12, 256  ;;  %p818_p6 = scmp.lt.u32.totalorder %s1143_s12, %s1426_s1 }
  0x26   : > { %p813_p2 = scmp.ne.s32.totalorder %s1143_s12, %s812_s24  ;;  %p819_p7 = scmp.lt.u32.totalorder %s817_s11, %s812_s24 }
  0x27   : > { %p821_p13 = scmp.lt.u32.totalorder %s812_s24, %s1143_s12 }
  0x28   : > { %p815_p4 = pnand %p1156_p3, %p813_p2  ;;  %p820_p10 = por %p819_p7, %p818_p6 }
  0x2a   : > { %p816_p5 = pneg %p815_p4  ;;  %p822_p12 = por %p821_p13, %p820_p10 }
  0x2c   : > { %p823_p1 = pnand %p822_p12, %p816_p5 }
  0x2e   : > { %826 = shalt.err (!%p823_p1)
}
  0x2f   : > { %s827_s9 = scalar_lea.vmem %s1147_s14, 256  ;;  %s1022_s26 = smov [#allocation5]  }
  0x30   : > { %p828_p2 = scmp.ne.s32.totalorder %s1147_s14, %s827_s9  ;;  %s832_s10 = sshll.u32 %s1022_s26, 4  ;;  %s833_s10 = int_to_ptr.vmem [resolvable:$false] %s832_s10 }
  0x31   : > { %s834_s6 = scalar_lea.vmem %s833_s10, 512  ;;  %p835_p9 = scmp.lt.s32.totalorder %s1147_s14, %s833_s10 }
  0x32   : > { %p830_p4 = pnand %p828_p2, %p1156_p3  ;;  %p836_p8 = scmp.lt.s32.totalorder %s834_s6, %s827_s9 }
  0x34   : > { %p831_p11 = pneg %p830_p4  ;;  %p837_p6 = por %p836_p8, %p835_p9 }
  0x36   : > { %p838_p7 = pnand %p837_p6, %p831_p11 }
  0x38   : > { %841 = shalt.err (!%p838_p7)
}
  0x39   : > { %s1411_s24 = smov 256   ;;  %s1412_s11 = smov 128  }
  0x3a   : > { %s1413_s13 = smov 8   ;;  %p255_p8 = scmp.lt.s32.totalorder %s1020_s20, 3 }
  0x3b   : > { %741 = dma.hbm_to_vmem [thread:$0]  (!%p1133_p0), %s1143_s12, 256, %s1147_s14, %s1150_s22, %s1411_s24, %s1412_s11, %s1413_s13  }
  0x3c   : > { %p1428_p9 = scmp.ge.s32.totalorder %s1020_s20, 1  ;;  %s1430_s0 = sld [smem:[#allocation18_spill]] }
  0x3d   : > { %s1431_s1 = sshll.u32 %s1127_s5, 4  ;;  %s701_s12 = sshll.u32 %s1127_s5, 2 }
  0x3e   : > { %p1186_p11 = pnand %p1428_p9, %p255_p8  ;;  %s197_s23 = scalar_lea.vmem [#allocation2], %s1431_s1 }
  0x3f   : > { %s205_s29 = sshll.u32 %s197_s23, 4  ;;  %s194_s14 = scalar_lea.sflag [#allocation3], %s1127_s5  ;;  %s1199_s29 = int_to_ptr.vmem [resolvable:$true] %s205_s29 }
  0x40   : > { %s1429_s9 = scalar_select %p1186_p11, 1, 0 }
  0x42   : > { %s1195_s6 = scalar_lea.hbm %s1430_s0, %s720_s7  ;;  %s847_s7 = scalar_lea.hbm %s1430_s0, 512 }
  0x43   : > { %s842_s24 = scalar_lea.hbm %s1195_s6, 256  ;;  %p848_p10 = scmp.lt.u32.totalorder %s1195_s6, %s1430_s0 }
  0x44   : > { %p843_p12 = scmp.ne.s32.totalorder %s1195_s6, %s842_s24  ;;  %p849_p13 = scmp.lt.u32.totalorder %s847_s7, %s842_s24 }
  0x45   : > { %p851_p4 = scmp.lt.u32.totalorder %s842_s24, %s1195_s6 }
  0x46   : > { %p845_p1 = pnand %p843_p12, %p1156_p3  ;;  %p850_p2 = por %p849_p13, %p848_p10 }
  0x48   : > { %p846_p5 = pneg %p845_p1  ;;  %p852_p6 = por %p851_p4, %p850_p2 }
  0x4a   : > { %p853_p7 = pnand %p852_p6, %p846_p5 }
  0x4c   : > { %856 = shalt.err (!%p853_p7)
}
  0x4d   : > { %s857_s1 = scalar_lea.vmem %s1199_s29, 256  ;;  %s1026_s23 = smov [#allocation2]  }
  0x4e   : > { %p858_p8 = scmp.ne.s32.totalorder %s1199_s29, %s857_s1  ;;  %s862_s11 = sshll.u32 %s1026_s23, 4  ;;  %s863_s11 = int_to_ptr.vmem [resolvable:$false] %s862_s11 }
  0x4f   : > { %s864_s13 = scalar_lea.vmem %s863_s11, 512  ;;  %p865_p1 = scmp.lt.s32.totalorder %s1199_s29, %s863_s11 }
  0x50   : > { %p860_p9 = pnand %p858_p8, %p1156_p3  ;;  %p866_p11 = scmp.lt.s32.totalorder %s864_s13, %s857_s1 }
  0x52   : > { %p861_p12 = pneg %p860_p9  ;;  %p867_p10 = por %p866_p11, %p865_p1 }
  0x54   : > { %p868_p13 = pnand %p867_p10, %p861_p12 }
  0x56   : > { %871 = shalt.err (!%p868_p13)
}
  0x57   : > { %s1432_s24 = smov 8   ;;  %s1433_s26 = smov 128  }
  0x58   : > { %s1434_s7 = smov 256   ;;  %s722_s10 = sshll.u32 %s1016_s19, 6 }
  0x59   : > { %738 = dma.hbm_to_vmem [thread:$0]  (!%p1133_p0), %s1195_s6, 256, %s1199_s29, %s194_s14, %s1434_s7, %s1433_s26, %s1432_s24  }
  0x5a   : > { %s1233_s1 = scalar_lea.hbm %s1404_s2, %s722_s10  ;;  %s241_s13 = scalar_lea.vmem [#allocation7], %s701_s12 }
  0x5b   : > { %s250_s0 = sshll.u32 %s241_s13, 4  ;;  %s872_s17 = scalar_lea.hbm %s1233_s1, 64  ;;  %s251_s0 = int_to_ptr.vmem [resolvable:$true] %s250_s0 }
  0x5c   : > { %p873_p11 = scmp.ne.s32.totalorder %s1233_s1, %s872_s17  ;;  %s877_s14 = scalar_lea.hbm %s1404_s2, 128 }
  0x5d   : > { %p878_p4 = scmp.lt.u32.totalorder %s1233_s1, %s1404_s2  ;;  %p879_p6 = scmp.lt.u32.totalorder %s877_s14, %s872_s17 }
  0x5e   : > { %p875_p5 = pnand %p873_p11, %p1156_p3  ;;  %p881_p8 = scmp.lt.u32.totalorder %s872_s17, %s1233_s1 }
  0x5f   : > { %p880_p7 = por %p879_p6, %p878_p4 }
  0x60   : > { %p876_p2 = pneg %p875_p5 }
  0x61   : > { %p882_p9 = por %p881_p8, %p880_p7 }
  0x63   : > { %p883_p12 = pnand %p882_p9, %p876_p2 }
  0x65   : > { %886 = shalt.err (!%p883_p12)
}
  0x66   : > { %s887_s5 = scalar_lea.vmem %s251_s0, 64  ;;  %s1027_s12 = smov [#allocation7]  }
  0x67   : > { %p888_p1 = scmp.ne.s32.totalorder %s251_s0, %s887_s5  ;;  %s892_s7 = sshll.u32 %s1027_s12, 4  ;;  %s893_s7 = int_to_ptr.vmem [resolvable:$false] %s892_s7 }
  0x68   : > { %s894_s10 = scalar_lea.vmem %s893_s7, 128  ;;  %p895_p11 = scmp.lt.s32.totalorder %s251_s0, %s893_s7 }
  0x69   : > { %p890_p10 = pnand %p888_p1, %p1156_p3  ;;  %p896_p5 = scmp.lt.s32.totalorder %s894_s10, %s887_s5 }
  0x6b   : > { %p891_p13 = pneg %p890_p10  ;;  %p897_p0 = por %p896_p5, %p895_p11 }
  0x6d   : > { %p898_p4 = pnand %p897_p0, %p891_p13 }
  0x6f   : > { %901 = shalt.err (!%p898_p4)
}
  0x70   : > { %p1435_p6 = scmp.ne.s32.totalorder %s1425_s8, 0  ;;  %p1436_p2 = scmp.ne.s32.totalorder %s1429_s9, 0 }
  0x71   : > { %s1258_s17 = sand.u32 (!%p1436_p2), 1, %s1004_s16   ;;  %p1437_p3 = scmp.ne.s32.totalorder (!%p1436_p2), %s1421_s27, 0 }
  0x72   : > { %744 = dma.hbm_to_vmem [thread:$0]  (!%p1435_p6), %s1233_s1, 64, %s251_s0, %s1150_s22  }
  0x73   : > { %259 = sbr.rel (%p1436_p2) target bundleno = 208 (0xd0), region = 32  ;;  %s705_s25 = sshll.u32 (!%p1436_p2), %s1258_s17, 4 }
  0x74   : > { %s262_s23 = scalar_lea.sflag (!%p1436_p2), [#allocation3], %s1258_s17  ;;  %s265_s11 = scalar_lea.vmem (!%p1436_p2), [#allocation2], %s705_s25 }
  0x7a   : > { %983 = dma.done.wait (%p1437_p3), %s262_s23, 256  }
  0x7b   : > { %985 = vsyncadd (%p1437_p3), %s262_s23, 4294967040  ;;  %s270_s0 = sand.u32 1, %s1089_s21   ;;  %s274_s22 = scalar_lea.vmem [#allocation5], %s705_s25 }
  0x7c   : > { %s271_s8 = scalar_lea.sflag [#allocation6], %s270_s0 }
  0x7d   : > { %987 = dma.done.wait (%p1437_p3), %s271_s8, 320  }
  0x7e   : > { %989 = vsyncadd (%p1437_p3), %s271_s8, 4294966976  ;;  %s707_s9 = sshll.u32 %s1258_s17, 2  ;;  %v1028_v0 = vmov 0.0   ;;  %v1029_v1 = vmov 1983009808   ;;  %v393_v3 = vlaneseq  ;;  %v335_v6 = vld [vmem:[%s274_s22] sm:$0xff] }
  0x7f   : > { %s1272_s1 = scalar_lea.vmem [#allocation8], %s707_s9  ;;  %v391_v2 = vunpack.c.l.s4 %v1029_v1  ;;  %s1275_s13 = scalar_lea.vmem [#allocation9], %s707_s9  ;;  %v336_v7 = vld [vmem:[%s274_s22 + $0x8] sm:$0xff]  ;;  %v337_v8 = vld [vmem:[%s265_s11] sm:$0xff]  ;;  %vm340_vm0 = vweird.f32 %v335_v6  ;;  %vm1030_vm2 = vmmov 1   ;;  %vm354_vm5 = vcmask 1043456  }
  0x80   : > { %333 = vst [vmem:[%s1272_s1] sm:$0xf] %v1028_v0  ;;  %334 = vst [vmem:[%s1275_s13] sm:$0xf] %v1028_v0  ;;  %v394_v5 = vshrl.u32 %v393_v3, 7  ;;  %v338_v9 = vld [vmem:[%s265_s11 + $0x8] sm:$0xff]  ;;  %s283_s21 = scalar_lea.vmem [#allocation7], %s707_s9  ;;  %vm341_vm1 = vweird.f32 %v336_v7  ;;  %v344_v11 = vsub.f32 %v335_v6, %v337_v8  ;;  %vm459_vm6 = vcmask 1041409  }
  0x81   : > { %v392_v4 = vunpack.c.0.s8 %v391_v2  ;;  %v339_v10 = vld [vmem:[%s283_s21] sm:$0xf]  ;;  %vm1278_vm3 = vmxor %vm340_vm0, %vm1030_vm2  ;;  %v345_v13 = vsub.f32 %v336_v7, %v338_v9  ;;  %vm461_vm7 = vcmask 1043459   ;;  %vm463_vm8 = vcmask 1045509   ;;  %s723_s27 = sshll.u32 %s1012_s18, 6  ;;  %s535_s29 = sshll.u32 %s1275_s13, 4  ;;  %s1308_s29 = int_to_ptr.vmem [resolvable:$true] %s535_s29 }
  0x82   : > { %v383_v14 = vmul.f32 0.16666667, %v339_v10  ;;  %vm1282_vm4 = vmxor %vm341_vm1, %vm1030_vm2  ;;  %v346_v16 = vand.u32 2147483647, %v344_v11  ;;  %v710_v18 = vsel %vm1278_vm3, 1.0, %v1028_v0  ;;  %vm465_vm9 = vcmask 1047559   ;;  %s1306_s24 = scalar_lea.hbm %s1406_s4, %s723_s27 }
  0x83   : > { %v1286_v17 = vsub.s32 %v392_v4, %v394_v5  ;;  %v347_v19 = vand.u32 2147483647, %v345_v13  ;;  %v711_v20 = vsel %vm1282_vm4, 1.0, %v1028_v0  ;;  %s507_s26 = scalar_lea.sflag [#allocation10], %s1258_s17  ;;  %s902_s5 = scalar_lea.vmem %s1308_s29, 64 }
  0x84   : > { %808 = vtanh.f32 %v383_v14  ;;  %v350_v21 = vcombine.high %v346_v16, %v346_v16  ;;  %v355_v25 = vsel %vm354_vm5, %v346_v16, 0.0  ;;  %p903_p0 = scmp.ne.s32.totalorder %s1308_s29, %s902_s5  ;;  %p1442_p7 = scmp.ne.s32.totalorder %s1422_s28, 0 }
  0x85   : > { %v483_v22 = vrot.slane %v710_v18, %v1286_v17  ;;  %v490_v23 = vrot.slane %v711_v20, %v1286_v17  ;;  %v351_v24 = vcombine.high %v347_v19, %v347_v19  ;;  %v369_v28 = vsel %vm354_vm5, %v347_v19, 0.0  ;;  %s1031_s12 = smov [#allocation9]  }
  0x86   : > { %v362_v27 = vsel %vm354_vm5, %v350_v21, 0.0  ;;  %v356_v30 = vrot.slane %v355_v25, 4  ;;  %v370_v36 = vrot.slane %v369_v28, 4  ;;  %p904_p8 = pnand %p903_p0, %p1442_p7  ;;  %s906_s7 = sshll.u32 %s1031_s12, 4  ;;  %s907_s7 = int_to_ptr.vmem [resolvable:$false] %s906_s7 }
  0x87   : > { %v493_v26 = vrot.slane %v490_v23, 7  ;;  %v376_v31 = vsel %vm354_vm5, %v351_v24, 0.0  ;;  %v470_v32 = vld [vmem:[%s1275_s13] sm:$0xf]  ;;  %v363_v35 = vrot.slane %v362_v27, 4  ;;  %s908_s10 = scalar_lea.vmem %s907_s7, 128  ;;  %p909_p12 = scmp.lt.s32.totalorder %s1308_s29, %s907_s7 }
  0x88   : > { %v377_v38 = vrot.slane %v376_v31, 4  ;;  %v357_v41 = vadd.f32 %v356_v30, %v355_v25  ;;  %v371_v44 = vadd.f32 %v370_v36, %v369_v28  ;;  %p905_p9 = pneg %p904_p8  ;;  %p910_p1 = scmp.lt.s32.totalorder %s908_s10, %s902_s5 }
  0x89   : > { %v494_v29 = vsel %vm459_vm6, %v493_v26, %v483_v22  ;;  %v364_v43 = vadd.f32 %v363_v35, %v362_v27 }
  0x8a   : > { %v495_v33 = vsel %vm461_vm7, %v493_v26, %v494_v29  ;;  %p911_p10 = por %p910_p1, %p909_p12 }
  0x8b   : > { %v496_v34 = vsel %vm463_vm8, %v493_v26, %v495_v33 }
  0x8c   : > { %v497_v37 = vsel %vm465_vm9, %v493_v26, %v496_v34  ;;  %p912_p13 = pnand %p911_p10, %p905_p9 }
  0x8d   : > { %v499_v39 = vadd.f32 %v497_v37, %v470_v32 }
  0x8e   : > { %v809_v40 = vpop.eup %808 }
  0x8f   : > { %v385_v42 = vmul.f32 3.0, %v809_v40  ;;  %500 = vst [vmem:[%s1275_s13] sm:$0xf] %v499_v39 }
  0x90   : > { %915 = shalt.err (!%p912_p13)
}
  0x91   : > { %s916_s25 = scalar_lea.hbm %s1306_s24, 64  ;;  %s920_s0 = scalar_lea.hbm %s1406_s4, 128 }
  0x92   : > { %p917_p11 = scmp.ne.s32.totalorder %s1306_s24, %s916_s25  ;;  %p921_p6 = scmp.lt.u32.totalorder %s1306_s24, %s1406_s4 }
  0x93   : > { %p922_p2 = scmp.lt.u32.totalorder %s920_s0, %s916_s25  ;;  %p924_p0 = scmp.lt.u32.totalorder %s916_s25, %s1306_s24 }
  0x94   : > { %p918_p5 = pnand %p917_p11, %p1442_p7 }
  0x95   : > { %p923_p3 = por %p922_p2, %p921_p6 }
  0x96   : > { %p919_p4 = pneg %p918_p5 }
  0x97   : > { %p925_p8 = por %p924_p0, %p923_p3 }
  0x99   : > { %p926_p9 = pnand %p925_p8, %p919_p4 }
  0x9b   : > { %929 = shalt.err (!%p926_p9)
}
  0x9c   : > { %732 = dma.vmem_to_hbm [thread:$0]  (%p1442_p7), %s1308_s29, 64, %s1306_s24, %s507_s26   ;;  %v378_v45 = vadd.f32 %v377_v38, %v376_v31  ;;  %v386_v46 = vsub.f32 0.0, %v385_v42  ;;  %v358_v47 = vrot.slane %v357_v41, 2  ;;  %v365_v49 = vrot.slane %v364_v43, 2  ;;  %v437_v28 = vld [vmem:[%s1272_s1] sm:$0xf] }
  0x9d   : > { %v372_v50 = vrot.slane %v371_v44, 2  ;;  %v415_v57 = vrot.slane %v385_v42, %v1286_v17  ;;  %s521_s9 = sshll.u32 %s1272_s1, 4  ;;  %s1352_s29 = scalar_lea.hbm %s1405_s3, %s723_s27  ;;  %s1354_s9 = int_to_ptr.vmem [resolvable:$true] %s521_s9 }
  0x9e   : > { %v387_v48 = vmul.f32 1.442695, %v386_v46  ;;  %v379_v51 = vrot.slane %v378_v45, 2  ;;  %v359_v52 = vadd.f32 %v358_v47, %v357_v41  ;;  %v366_v53 = vadd.f32 %v365_v49, %v364_v43  ;;  %s502_s6 = scalar_lea.sflag [#allocation4], %s1258_s17  ;;  %s930_s14 = scalar_lea.vmem %s1354_s9, 64 }
  0x9f   : > { %v373_v54 = vadd.f32 %v372_v50, %v371_v44  ;;  %v416_v63 = vcombine.high %v415_v57, %v415_v57  ;;  %v417_v7 = vrot.slane %v415_v57, 1  ;;  %p931_p12 = scmp.ne.s32.totalorder %s1354_s9, %s930_s14  ;;  %s1032_s24 = smov [#allocation8]  }
  0xa0   : > { %810 = vpow2.f32 %v387_v48  ;;  %v380_v55 = vadd.f32 %v379_v51, %v378_v45  ;;  %v360_v56 = vrot.slane %v359_v52, 1  ;;  %v367_v58 = vrot.slane %v366_v53, 1  ;;  %s934_s26 = sshll.u32 %s1032_s24, 4  ;;  %s935_s26 = int_to_ptr.vmem [resolvable:$false] %s934_s26 }
  0xa1   : > { %v374_v59 = vrot.slane %v373_v54, 1  ;;  %v418_v8 = vrot.slane %v416_v63, 1  ;;  %p932_p1 = pnand %p931_p12, %p1442_p7  ;;  %s936_s18 = scalar_lea.vmem %s935_s26, 128 }
  0xa2   : > { %v381_v60 = vrot.slane %v380_v55, 1  ;;  %v361_v61 = vadd.f32 %v360_v56, %v359_v52  ;;  %v368_v0 = vadd.f32 %v367_v58, %v366_v53  ;;  %p937_p13 = scmp.lt.s32.totalorder %s1354_s9, %s935_s26  ;;  %p938_p11 = scmp.lt.s32.totalorder %s936_s18, %s930_s14 }
  0xa3   : > { %v375_v1 = vadd.f32 %v374_v59, %v373_v54  ;;  %p933_p10 = pneg %p932_p1 }
  0xa4   : > { %v382_v3 = vadd.f32 %v381_v60, %v380_v55  ;;  %p939_p5 = por %p938_p11, %p937_p13 }
  0xa6   : > { %p940_p4 = pnand %p939_p5, %p933_p10 }
  0xaa   : > { %v811_v62 = vpop.eup %810 }
  0xab   : > { %v396_v2 = vrot.slane %v811_v62, %v1286_v17 }
  0xad   : > { %v397_v4 = vcombine.high %v396_v2, %v396_v2  ;;  %v398_v5 = vrot.slane %v396_v2, 1  ;;  %v404_v6 = vmul.f32 %v396_v2, %v361_v61 }
  0xaf   : > { %v399_v9 = vrot.slane %v397_v4, 1  ;;  %v405_v10 = vmul.f32 %v397_v4, %v368_v0  ;;  %v406_v11 = vmul.f32 %v398_v5, %v375_v1  ;;  %v423_v13 = vadd.f32 %v415_v57, %v404_v6 }
  0xb1   : > { %v407_v14 = vmul.f32 %v399_v9, %v382_v3  ;;  %v424_v16 = vadd.f32 %v416_v63, %v405_v10  ;;  %v425_v18 = vadd.f32 %v417_v7, %v406_v11 }
  0xb3   : > { %v426_v19 = vadd.f32 %v418_v8, %v407_v14  ;;  %v431_v20 = vcombine.low %v423_v13, %v424_v16 }
  0xb5   : > { %v432_v21 = vcombine.low %v425_v18, %v426_v19  ;;  %v435_v22 = vsel %vm1278_vm3, %v431_v20, 0.0 }
  0xb6   : > { %v446_v24 = vrot.slane %v435_v22, %v1286_v17 }
  0xb7   : > { %v436_v23 = vsel %vm1282_vm4, %v432_v21, 0.0 }
  0xb8   : > { %v453_v25 = vrot.slane %v436_v23, %v1286_v17 }
  0xba   : > { %v458_v26 = vrot.slane %v453_v25, 7 }
  0xbc   : > { %v460_v27 = vsel %vm459_vm6, %v458_v26, %v446_v24 }
  0xbd   : > { %v462_v29 = vsel %vm461_vm7, %v458_v26, %v460_v27 }
  0xbe   : > { %v464_v30 = vsel %vm463_vm8, %v458_v26, %v462_v29 }
  0xbf   : > { %v466_v12 = vsel %vm465_vm9, %v458_v26, %v464_v30 }
  0xc0   : > { %v468_v31 = vadd.f32 %v466_v12, %v437_v28 }
  0xc2   : > { %469 = vst [vmem:[%s1272_s1] sm:$0xf] %v468_v31 }
  0xc3   : > { %943 = shalt.err (!%p940_p4)
}
  0xc4   : > { %s944_s17 = scalar_lea.hbm %s1352_s29, 64  ;;  %s948_s5 = scalar_lea.hbm %s1405_s3, 128 }
  0xc5   : > { %p945_p6 = scmp.ne.s32.totalorder %s1352_s29, %s944_s17  ;;  %p949_p0 = scmp.lt.u32.totalorder %s1352_s29, %s1405_s3 }
  0xc6   : > { %p950_p8 = scmp.lt.u32.totalorder %s948_s5, %s944_s17  ;;  %p952_p12 = scmp.lt.u32.totalorder %s944_s17, %s1352_s29 }
  0xc7   : > { %p946_p2 = pnand %p945_p6, %p1442_p7 }
  0xc8   : > { %p951_p9 = por %p950_p8, %p949_p0 }
  0xc9   : > { %p947_p3 = pneg %p946_p2 }
  0xca   : > { %p953_p1 = por %p952_p12, %p951_p9 }
  0xcc   : > { %p954_p10 = pnand %p953_p1, %p947_p3 }
  0xce   : > { %957 = shalt.err (!%p954_p10)
}
  0xcf   : > { %731 = dma.vmem_to_hbm [thread:$0]  (%p1442_p7), %s1354_s9, 64, %s1352_s29, %s502_s6  }
  0xd0 PF: > { %s547_s10 = sand.u32 1, %s1000_s15   ;;  %p1443_p13 = scmp.ne.s32.totalorder %s1424_s30, 0 }
  0xd1   : > { %p1444_p11 = scmp.ge.s32.totalorder %s1020_s20, 2  ;;  %s548_s25 = scalar_lea.sflag [#allocation4], %s547_s10 }
  0xd3   : > { %p746_p5 = pnand %p1444_p11, %p1443_p13 }
  0xd5   : > { %991 = dma.done.wait (!%p746_p5), %s548_s25, 64  }
  0xd6   : > { %993 = vsyncadd (!%p746_p5), %s548_s25, 4294967232  ;;  %s557_s23 = scalar_lea.sflag [#allocation10], %s547_s10 }
  0xd7   : > { %995 = dma.done.wait (!%p746_p5), %s557_s23, 64  }
  0xd8   : > { %997 = vsyncadd (!%p746_p5), %s557_s23, 4294967232  ;;  %s27_s20 = sadd.s32 1, %s1020_s20   ;;  %s1445_s28 = sld [smem:[#allocation15_spill]] }
  0xd9   : > { %p24_p4 = scmp.ge.s32.totalorder %s27_s20, 4   ;;  %s1446_s17 = sld [smem:[#allocation17_spill]] }
  0xda   : > { %s1447_s11 = sld [smem:[#allocation16_spill]]  ;;  %s1448_s15 = smov %s1004_s16 }
  0xdb   : > { %s1450_s18 = smov %s1016_s19  ;;  %26 = sbr.rel (!%p24_p4) target bundleno = 13 (0xd), region = 122 }
  0xde   : > { %s1449_s16 = smov %s1445_s28 }
  0xe0   : > { %s1451_s19 = smov %s1447_s11 }
  0xe2   :  { %562 = vsyncpa [#allocation3], 1 }
  0xe3   :  { %564 = vsyncpa [#allocation3 + $0x1], 1 }
  0xe4   :  { %565 = vsyncpa [#allocation6], 1 }
  0xe5   :  { %567 = vsyncpa [#allocation6 + $0x1], 1 }
  0xe6   :  { %568 = vsyncpa [#allocation4], 1 }
  0xe7   :  { %570 = vsyncpa [#allocation4 + $0x1], 1 }
  0xe8   :  { %571 = vsyncpa [#allocation10], 1 }
  0xe9   :  { %573 = vsyncpa [#allocation10 + $0x1], 1 }

</bundles_post_ra>
